<compile_context>
chip_gen: v6e
topology: v6e:2x2x1
jax: 0.10.0
libtpu: 0.0.40
codegen_flags: <defaults>
</compile_context>

<pallas_src>
import functools

import jax
import jax.numpy as jnp
from jax.experimental import pallas as pl
from jax.experimental.pallas import tpu as pltpu


def _round_up(x, k):
    return (x + k - 1) // k * k


def _contrastive_flat_kernel(y1_ref, y2_ref, out_ref, *, m, eps, n_rows, d_cols):
    """Lane-dense path: inputs are (TB, N*D) blocks.

    out_ref[:, 0] = mean_n(euc^2)              (similar-pair term)
    out_ref[:, 1] = mean_n(clamp(m - euc, 0)^2) (dissimilar-pair term)
    """
    a = y1_ref[...].astype(jnp.float32)
    b = y2_ref[...].astype(jnp.float32)
    diff = a - b + jnp.float32(eps)            # matches torch pairwise_distance eps
    sq = diff * diff                           # (TB, N*D)

    # pos = mean_n(sum_d sq) = sum_{n,d} sq / N
    pos = jnp.sum(sq, axis=-1, keepdims=True) * jnp.float32(1.0 / n_rows)

    # Segmented sum over D-sized lane groups via a 0/1 block matrix on the MXU.
    nd = n_rows * d_cols
    row = jax.lax.broadcasted_iota(jnp.int32, (nd, n_rows), 0)
    col = jax.lax.broadcasted_iota(jnp.int32, (nd, n_rows), 1)
    start = col * d_cols
    seg = jnp.logical_and(row >= start, row < start + d_cols).astype(jnp.float32)
    sq_dist = jnp.dot(sq, seg, precision=jax.lax.Precision.HIGHEST,
                      preferred_element_type=jnp.float32)      # (TB, N) == euc^2

    euc = jnp.sqrt(sq_dist)
    delta = jnp.maximum(jnp.float32(m) - euc, 0.0)
    neg = jnp.mean(delta * delta, axis=-1, keepdims=True)       # (TB, 1)

    out_ref[:, 0:1] = pos
    out_ref[:, 1:2] = neg


def _contrastive_3d_kernel(y1_ref, y2_ref, out_ref, *, m, eps):
    """Natural (TB, N, D) path, used when D is already a multiple of 128."""
    a = y1_ref[...].astype(jnp.float32)
    b = y2_ref[...].astype(jnp.float32)
    diff = a - b + jnp.float32(eps)
    sq_dist = jnp.sum(diff * diff, axis=-1)                     # (TB, N) == euc^2
    euc = jnp.sqrt(sq_dist)

    pos = jnp.mean(sq_dist, axis=-1, keepdims=True)             # (TB, 1)
    delta = jnp.maximum(jnp.float32(m) - euc, 0.0)
    neg = jnp.mean(delta * delta, axis=-1, keepdims=True)       # (TB, 1)

    out_ref[:, 0:1] = pos
    out_ref[:, 1:2] = neg


@functools.partial(jax.jit, static_argnames=("m", "block_b"))
def contrastive_loss(y1, y2, d, m=2.0, block_b=None):
    """y1, y2: [B, N, D] float; d: [B] int (0 = similar, nonzero = dissimilar)."""
    B, N, D = y1.shape
    assert y2.shape == (B, N, D) and d.shape == (B,)

    itemsize = jnp.dtype(y1.dtype).itemsize
    sublane = max(8, 32 // itemsize)        # sublane tile: 8 f32 / 16 bf16 / 32 int8

    # Per-TensorCore VMEM capacity; fall back to the smallest generation (v7x: 64 MiB).
    try:
        vmem_cap = int(pltpu.get_tpu_info().vmem_capacity_bytes)
    except Exception:
        vmem_cap = 64 << 20

    # Lane-dense path: fold (N, D) into one lane axis whenever D would be lane-padded,
    # as long as the segmented-sum helper matrix / MXU work stays modest.
    use_flat = (D % 128 != 0) and (N * D * N * 4 <= (4 << 20))

    if use_flat:
        per_sample_vmem = _round_up(N * D, 128) * itemsize
    else:
        per_sample_vmem = _round_up(N, sublane) * _round_up(D, 128) * itemsize

    # 2 inputs x 2 pipeline buffers may occupy ~2/3 of VMEM -> per-tile budget cap/6.
    budget = vmem_cap // 6
    if block_b is None:
        tb = max(1, budget // per_sample_vmem)
        # Keep >= 2 blocks for larger batches so the "parallel" batch axis shards
        # across both v7x TensorCores (one extra ~0.35us grid step on 1-TC chips).
        if B >= 16:
            tb = min(tb, _round_up(pl.cdiv(B, 2), 8))
    else:
        tb = int(block_b)
    tb = min(tb, B)
    if tb < B:
        # Blocks smaller than the full batch must have tb % 8 == 0.
        tb = max(8, (tb // 8) * 8)
        # TODO(synk): if a single sample's tile alone exceeds the VMEM budget, add a
        # second ("arbitrary") grid axis over N with partial accumulation via pl.when.

    grid_b = pl.cdiv(B, tb)
    b_pad = grid_b * tb                      # pad per-sample outputs: every block full

    if use_flat:
        tile_vmem = _round_up(tb, sublane) * _round_up(N * D, 128) * itemsize
    else:
        tile_vmem = tb * _round_up(N, sublane) * _round_up(D, 128) * itemsize
    vmem_limit = int(min(vmem_cap - (8 << 20),
                         max(4 * tile_vmem + (8 << 20), 32 << 20)))
    vmem_limit = max(vmem_limit, 16 << 20)

    flops = 5 * B * N * D + 8 * B * N
    if use_flat:
        flops += 2 * B * N * N * D           # segmented-sum matmul on the MXU
    bytes_accessed = 2 * B * N * D * itemsize + b_pad * 2 * 4
    cost = pl.CostEstimate(flops=flops, transcendentals=B * N,
                           bytes_accessed=bytes_accessed)

    if use_flat:
        kernel = functools.partial(_contrastive_flat_kernel, m=float(m), eps=1e-6,
                                   n_rows=N, d_cols=D)
        y1_in = y1.reshape(B, N * D)         # zero-copy merge of contiguous dims
        y2_in = y2.reshape(B, N * D)
        in_specs = [pl.BlockSpec((tb, N * D), lambda i: (i, 0)),
                    pl.BlockSpec((tb, N * D), lambda i: (i, 0))]
    else:
        kernel = functools.partial(_contrastive_3d_kernel, m=float(m), eps=1e-6)
        y1_in, y2_in = y1, y2
        in_specs = [pl.BlockSpec((tb, N, D), lambda i: (i, 0, 0)),
                    pl.BlockSpec((tb, N, D), lambda i: (i, 0, 0))]

    out = pl.pallas_call(
        kernel,
        out_shape=jax.ShapeDtypeStruct((b_pad, 2), jnp.float32),
        grid=(grid_b,),
        in_specs=in_specs,
        out_specs=pl.BlockSpec((tb, 2), lambda i: (i, 0)),
        compiler_params=pltpu.CompilerParams(
            dimension_semantics=("parallel",),   # no cross-step state
            vmem_limit_bytes=vmem_limit,
        ),
        cost_estimate=cost,
    )(y1_in, y2_in)

    # Tiny epilogue on (B,) vectors: per-sample select on d, mean over the true B.
    # (Padded rows past B may be garbage/NaN from OOB block reads -> never reduce them.)
    pos = out[:B, 0]
    neg = out[:B, 1]
    per_sample = jnp.where(d == 0, pos, neg)
    return jnp.mean(per_sample)


def _contrastive_loss_ref(y1, y2, d, m=2.0):
    diff = y1.astype(jnp.float32) - y2.astype(jnp.float32) + 1e-6
    euc = jnp.sqrt(jnp.sum(diff * diff, axis=-1))        # (B, N)
    pos = jnp.mean(euc * euc, axis=-1)                   # (B,)
    neg = jnp.mean(jnp.maximum(m - euc, 0.0) ** 2, axis=-1)
    per = jnp.where(d == 0, pos, neg)
    return jnp.mean(per)


if __name__ == "__main__":
    key = jax.random.PRNGKey(0)
    keys = jax.random.split(key, 12)

    # 1) Primary test (small shapes, lane-dense flat path, single block).
    B, N, D = 2, 8, 32
    y1 = jax.random.normal(keys[0], (B, N, D), dtype=jnp.float32)
    y2 = jax.random.normal(keys[1], (B, N, D), dtype=jnp.float32)
    d = jax.random.randint(keys[2], (B,), 0, 2, dtype=jnp.int32)
    out = jax.block_until_ready(contrastive_loss(y1, y2, d, m=2.0))
    ref = _contrastive_loss_ref(y1, y2, d, m=2.0)
    assert jnp.allclose(out, ref, rtol=1e-5, atol=1e-5), (out, ref)

    # 2) Multi-block flat path with a partial trailing block (B=20, block_b=8 -> grid 3).
    B2 = 20
    y1b = jax.random.normal(keys[3], (B2, N, D), dtype=jnp.float32)
    y2b = jax.random.normal(keys[4], (B2, N, D), dtype=jnp.float32)
    db = jax.random.randint(keys[5], (B2,), 0, 2, dtype=jnp.int32)
    out2 = jax.block_until_ready(contrastive_loss(y1b, y2b, db, m=2.0, block_b=8))
    ref2 = _contrastive_loss_ref(y1b, y2b, db, m=2.0)
    assert jnp.allclose(out2, ref2, rtol=1e-5, atol=1e-5), (out2, ref2)

    # 3) D % 128 == 0 -> natural (TB, N, D) path (no lane padding to remove).
    B3, D3 = 4, 128
    y1c = jax.random.normal(keys[6], (B3, N, D3), dtype=jnp.float32)
    y2c = jax.random.normal(keys[7], (B3, N, D3), dtype=jnp.float32)
    dc = jax.random.randint(keys[8], (B3,), 0, 2, dtype=jnp.int32)
    out3 = jax.block_until_ready(contrastive_loss(y1c, y2c, dc, m=2.0))
    ref3 = _contrastive_loss_ref(y1c, y2c, dc, m=2.0)
    assert jnp.allclose(out3, ref3, rtol=1e-5, atol=1e-5), (out3, ref3)

    # 4) bf16 activations stay bf16 in HBM; f32 upcast happens inside the kernel.
    B4 = 8
    y1d = jax.random.normal(keys[9], (B4, N, D), dtype=jnp.bfloat16)
    y2d = jax.random.normal(keys[10], (B4, N, D), dtype=jnp.bfloat16)
    dd = jax.random.randint(keys[11], (B4,), 0, 2, dtype=jnp.int32)
    out4 = jax.block_until_ready(contrastive_loss(y1d, y2d, dd, m=2.0))
    ref4 = _contrastive_loss_ref(y1d, y2d, dd, m=2.0)
    assert jnp.allclose(out4, ref4, rtol=1e-4, atol=1e-4), (out4, ref4)

    print("KERNEL_OK")
</pallas_src>

<mosaic_0001>
module attributes {stable_mosaic.version = 11 : i64} {
  func.func @_contrastive_flat_kernel(%arg0: i32, %arg1: memref<2x256xf32, #tpu.memory_space<vmem>>, %arg2: memref<2x256xf32, #tpu.memory_space<vmem>>, %arg3: memref<2x2xf32, #tpu.memory_space<vmem>>) attributes {dimension_semantics = [#tpu.dimension_semantics<parallel>], iteration_bounds = array<i64: 1>, scalar_prefetch = 0 : i64, scratch_operands = 0 : i64, tpu.core_type = #tpu.core_type<tc>, window_params = [{transform_indices = @transform_0, window_bounds = array<i64: 2, 256>}, {transform_indices = @transform_1, window_bounds = array<i64: 2, 256>}, {transform_indices = @transform_2, window_bounds = array<i64: 2, 2>}]} {
    %c0 = arith.constant 0 : index
    %c0_0 = arith.constant 0 : index
    %0 = vector.load %arg1[%c0, %c0_0] : memref<2x256xf32, #tpu.memory_space<vmem>>, vector<2x256xf32>
    %c0_1 = arith.constant 0 : index
    %c0_2 = arith.constant 0 : index
    %1 = vector.load %arg2[%c0_1, %c0_2] : memref<2x256xf32, #tpu.memory_space<vmem>>, vector<2x256xf32>
    %2 = arith.subf %0, %1 : vector<2x256xf32>
    %cst = arith.constant 9.99999997E-7 : f32
    %3 = vector.broadcast %cst : f32 to vector<2x256xf32>
    %4 = arith.addf %2, %3 : vector<2x256xf32>
    %5 = arith.mulf %4, %4 : vector<2x256xf32>
    %cst_3 = arith.constant dense<0.000000e+00> : vector<2xf32>
    %6 = vector.multi_reduction <add>, %5, %cst_3 [1] : vector<2x256xf32> to vector<2xf32>
    %7 = vector.shape_cast %6 : vector<2xf32> to vector<2x1xf32>
    %cst_4 = arith.constant 1.250000e-01 : f32
    %8 = vector.broadcast %cst_4 : f32 to vector<2x1xf32>
    %9 = arith.mulf %7, %8 : vector<2x1xf32>
    %10 = tpu.iota {dimensions = array<i32: 0>} : vector<256x8xi32>
    %11 = tpu.iota {dimensions = array<i32: 1>} : vector<256x8xi32>
    %c32_i32 = arith.constant 32 : i32
    %12 = vector.broadcast %c32_i32 : i32 to vector<256x8xi32>
    %13 = arith.muli %11, %12 : vector<256x8xi32>
    %14 = arith.cmpi sge, %10, %13 : vector<256x8xi32>
    %c32_i32_5 = arith.constant 32 : i32
    %15 = vector.broadcast %c32_i32_5 : i32 to vector<256x8xi32>
    %16 = arith.addi %13, %15 : vector<256x8xi32>
    %17 = arith.cmpi slt, %10, %16 : vector<256x8xi32>
    %18 = arith.andi %14, %17 : vector<256x8xi1>
    %19 = arith.extui %18 : vector<256x8xi1> to vector<256x8xi32>
    %20 = arith.sitofp %19 : vector<256x8xi32> to vector<256x8xf32>
    %cst_6 = arith.constant dense<0.000000e+00> : vector<2x8xf32>
    %21 = tpu.matmul %5, %20, %cst_6 {dimension_numbers = #tpu.dot_dimension_numbers<[1], [0], [0], [1], [0, 0, 1, 1], [], []>, precision = #tpu.contract_precision<fp32>} : vector<2x256xf32>, vector<256x8xf32>, vector<2x8xf32> -> vector<2x8xf32>
    %22 = math.sqrt %21 : vector<2x8xf32>
    %cst_7 = arith.constant 2.000000e+00 : f32
    %23 = vector.broadcast %cst_7 : f32 to vector<2x8xf32>
    %24 = arith.subf %23, %22 : vector<2x8xf32>
    %cst_8 = arith.constant 0.000000e+00 : f32
    %25 = vector.broadcast %cst_8 : f32 to vector<2x8xf32>
    %26 = arith.maximumf %24, %25 : vector<2x8xf32>
    %27 = arith.mulf %26, %26 : vector<2x8xf32>
    %cst_9 = arith.constant dense<0.000000e+00> : vector<2xf32>
    %28 = vector.multi_reduction <add>, %27, %cst_9 [1] : vector<2x8xf32> to vector<2xf32>
    %29 = vector.shape_cast %28 : vector<2xf32> to vector<2x1xf32>
    %cst_10 = arith.constant 8.000000e+00 : f32
    %30 = vector.broadcast %cst_10 : f32 to vector<2x1xf32>
    %31 = arith.divf %29, %30 : vector<2x1xf32>
    %c0_11 = arith.constant 0 : index
    %c0_12 = arith.constant 0 : index
    %32 = vector.load %arg3[%c0_11, %c0_12] : memref<2x2xf32, #tpu.memory_space<vmem>>, vector<2x1xf32>
    tpu.vector_store %arg3[%c0_11, %c0_12], %9 {strides = array<i32>} : memref<2x2xf32, #tpu.memory_space<vmem>>, vector<2x1xf32>,
    %c0_13 = arith.constant 0 : index
    %c1 = arith.constant 1 : index
    %33 = vector.load %arg3[%c0_13, %c1] : memref<2x2xf32, #tpu.memory_space<vmem>>, vector<2x1xf32>
    tpu.vector_store %arg3[%c0_13, %c1], %31 {strides = array<i32>} : memref<2x2xf32, #tpu.memory_space<vmem>>, vector<2x1xf32>,
    return
  }
  func.func @transform_0(%arg0: i32) -> (i32, i32) {
    %c0_i32 = arith.constant 0 : i32
    %c0_i32_0 = arith.constant 0 : i32
    return %arg0, %c0_i32 : i32, i32
  }
  func.func @transform_1(%arg0: i32) -> (i32, i32) {
    %c0_i32 = arith.constant 0 : i32
    %c0_i32_0 = arith.constant 0 : i32
    return %arg0, %c0_i32 : i32, i32
  }
  func.func @transform_2(%arg0: i32) -> (i32, i32) {
    %c0_i32 = arith.constant 0 : i32
    %c0_i32_0 = arith.constant 0 : i32
    return %arg0, %c0_i32 : i32, i32
  }
}

</mosaic_0001>

<bundles_post_ra>
// kernel: contrastive_loss.1
= control target key start
LH: loop header
LB: loop body
LE: loop exit
PB: predicated region body
PF: predicated region fallthrough
CT: control target
= control target key end

     0   :  { %v20_v0 = vlaneseq  ;;  %v1460_v3 = vmov 1983009808   ;;  %v2532_v20 = vmov 1.0   ;;  %v2548_v24 = vmov 0.0   ;;  %s2489_s0 = inlined_call_operand.vmem [shape: f32[2,256], index: 0, kind: input, shape index: {}]   ;;  %s2490_s1 = inlined_call_operand.vmem [shape: f32[2,256], index: 1, kind: input, shape index: {}]   ;;  %s2491_s2 = inlined_call_operand.vmem [shape: f32[2,2], index: 2, kind: output, shape index: {}]  }
   0x1   :  { %v1481_v1 = vld [vmem:[%s2489_s0] sm:$0xf]  ;;  %v1488_v4 = vunpack.c.l.s4 %v1460_v3  ;;  %v2631_v56 = vmov 0  ;;  %v2633_v59 = vmov 0 }
   0x2   :  { %v1486_v2 = vld [vmem:[%s2490_s1] sm:$0xf]  ;;  %v1490_v5 = vshrl.u32 %v20_v0, 7  ;;  %v68_v6 = vand.u32 127, %v20_v0  ;;  %v2635_v0 = vmov 0 }
   0x4   :  { %v66_v9 = vadd.s32 248, %v1490_v5  ;;  %v1496_v10 = vmul.u32 32, %v68_v6  ;;  %v50_v11 = vadd.s32 120, %v1490_v5  ;;  %v65_v12 = vadd.s32 240, %v1490_v5 }
   0x5   :  { %v49_v13 = vadd.s32 112, %v1490_v5  ;;  %v64_v14 = vadd.s32 232, %v1490_v5  ;;  %v48_v15 = vadd.s32 104, %v1490_v5  ;;  %v63_v16 = vadd.s32 224, %v1490_v5 }
   0x6   :  { %vm101_vm0 = vcmp.ge.s32.totalorder %v66_v9, %v1496_v10  ;;  %v1506_v17 = vadd.s32 32, %v1496_v10  ;;  %vm85_vm1 = vcmp.ge.s32.totalorder %v50_v11, %v1496_v10  ;;  %vm100_vm2 = vcmp.ge.s32.totalorder %v65_v12, %v1496_v10 }
   0x7   :  { %vm84_vm3 = vcmp.ge.s32.totalorder %v49_v13, %v1496_v10  ;;  %vm99_vm4 = vcmp.ge.s32.totalorder %v64_v14, %v1496_v10  ;;  %vm83_vm5 = vcmp.ge.s32.totalorder %v48_v15, %v1496_v10  ;;  %vm98_vm6 = vcmp.ge.s32.totalorder %v63_v16, %v1496_v10 }
   0x8   :  { %vm134_vm7 = vcmp.lt.s32.totalorder %v66_v9, %v1506_v17  ;;  %vm118_vm8 = vcmp.lt.s32.totalorder %v50_v11, %v1506_v17  ;;  %vm133_vm9 = vcmp.lt.s32.totalorder %v65_v12, %v1506_v17  ;;  %vm117_vm10 = vcmp.lt.s32.totalorder %v49_v13, %v1506_v17 }
   0x9   :  { %vm1518_vm11 = vmand %vm101_vm0, %vm134_vm7  ;;  %vm132_vm12 = vcmp.lt.s32.totalorder %v64_v14, %v1506_v17  ;;  %vm116_vm13 = vcmp.lt.s32.totalorder %v48_v15, %v1506_v17  ;;  %vm131_vm14 = vcmp.lt.s32.totalorder %v63_v16, %v1506_v17  ;;  %v47_v19 = vadd.s32 96, %v1490_v5 }
   0xa   :  { %1245 = vmatprep.subr.msk.mxu0 %vm1518_vm11, %v2532_v20  ;;  %vm1531_vm15 = vmand %vm85_vm1, %vm118_vm8  ;;  %v62_v22 = vadd.s32 216, %v1490_v5  ;;  %v46_v23 = vadd.s32 88, %v1490_v5  ;;  %v1148_v25 = vsel %vm1518_vm11, 1.0, %v2548_v24  ;;  %v61_v26 = vadd.s32 208, %v1490_v5 }
   0xb   :  { %1246 = vmatpush3.msk.msra.mxu0 %vm1531_vm15, %v2532_v20  ;;  %vm1548_vm0 = vmand %vm100_vm2, %vm133_vm9  ;;  %vm115_vm7 = vcmp.lt.s32.totalorder %v47_v19, %v1506_v17  ;;  %v1554_v28 = vsub.f32 %v1148_v25, %v1148_v25  ;;  %v1132_v29 = vsel %vm1531_vm15, 1.0, %v2548_v24  ;;  %v45_v47 = vadd.s32 80, %v1490_v5 }
   0xc   :  { %v1147_v30 = vsel %vm1548_vm0, 1.0, %v2548_v24  ;;  %1247 = vmatprep.subr.msk.mxu0 %vm1548_vm0, %v2532_v20  ;;  %vm1569_vm2 = vmand %vm84_vm3, %vm117_vm10  ;;  %vm97_vm8 = vcmp.ge.s32.totalorder %v62_v22, %v1496_v10  ;;  %vm130_vm9 = vcmp.lt.s32.totalorder %v62_v22, %v1506_v17  ;;  %vm114_vm10 = vcmp.lt.s32.totalorder %v46_v23, %v1506_v17 }
   0xd   :  { %2616 = vst [vmem:[#allocation2_spill] sm:$0xff] %v1554_v28  ;;  %v1576_v32 = vsub.f32 %v1147_v30, %v1147_v30  ;;  %v1131_v33 = vsel %vm1569_vm2, 1.0, %v2548_v24  ;;  %1248 = vmatpush3.msk.msra.mxu0 %vm1569_vm2, %v2532_v20  ;;  %vm1588_vm3 = vmand %vm99_vm4, %vm132_vm12  ;;  %v2523_v35 = vand.u32 4294901760, %v1554_v28  ;;  %vm96_vm12 = vcmp.ge.s32.totalorder %v61_v26, %v1496_v10 }
   0xe   :  { %v1594_v36 = vsub.f32 %v1131_v33, %v1131_v33  ;;  %v1146_v37 = vsel %vm1588_vm3, 1.0, %v2548_v24  ;;  %1249 = vmatprep.subr.msk.mxu0 %vm1588_vm3, %v2532_v20  ;;  %vm1606_vm4 = vmand %vm83_vm5, %vm116_vm13  ;;  %vm129_vm1 = vcmp.lt.s32.totalorder %v61_v26, %v1506_v17  ;;  %v1631_v43 = vsub.f32 %v1132_v29, %v1132_v29 }
   0xf   :  { %v1612_v39 = vsub.f32 %v1146_v37, %v1146_v37  ;;  %v1130_v40 = vsel %vm1606_vm4, 1.0, %v2548_v24  ;;  %1250 = vmatpush3.msk.msra.mxu0 %vm1606_vm4, %v2532_v20  ;;  %vm1624_vm5 = vmand %vm98_vm6, %vm131_vm14  ;;  %v459_v42 = vsub.f32 %v1554_v28, %v2523_v35  ;;  %vm2625_vm6 = vcmp.ge.s32.totalorder %v47_v19, %v1496_v10 }
  0x10   :  { %v1633_v44 = vsub.f32 %v1130_v40, %v1130_v40  ;;  %v1145_v45 = vsel %vm1624_vm5, 1.0, %v2548_v24  ;;  %1251 = vmatprep.subr.msk.mxu0 %vm1624_vm5, %v2532_v20  ;;  %vm1645_vm13 = vmand %vm2625_vm6, %vm115_vm7  ;;  %v2521_v48 = vand.u32 4294901760, %v1576_v32  ;;  %v2522_v53 = vand.u32 4294901760, %v1631_v43 }
  0x11   :  { %v1651_v49 = vsub.f32 %v1145_v45, %v1145_v45  ;;  %v1129_v50 = vsel %vm1645_vm13, 1.0, %v2548_v24  ;;  %1252 = vmatpush3.msk.msra.mxu0 %vm1645_vm13, %v2532_v20  ;;  %vm1663_vm14 = vmand %vm97_vm8, %vm130_vm9  ;;  %v460_v52 = vand.u32 4294901760, %v459_v42  ;;  %vm2630_vm7 = vcmp.ge.s32.totalorder %v46_v23, %v1496_v10 }
  0x12   :  { %v1668_v54 = vsub.f32 %v1129_v50, %v1129_v50  ;;  %v1144_v55 = vsel %vm1663_vm14, 1.0, %v2548_v24  ;;  %1253 = vmatprep.subr.msk.mxu0 %vm1663_vm14, %v2532_v20  ;;  %vm1680_vm8 = vmand %vm2630_vm7, %vm114_vm10  ;;  %vm80_vm9 = vcmp.ge.s32.totalorder %v45_v47, %v1496_v10  ;;  %vm113_vm6 = vcmp.lt.s32.totalorder %v45_v47, %v1506_v17 }
  0x13   :  { %v2632_v56 = vsel %vm1680_vm8, 4294967295, %v2631_v56  ;;  %v1686_v57 = vsub.f32 %v1144_v55, %v1144_v55  ;;  %v1128_v58 = vsel %vm1680_vm8, 1.0, %v2548_v24  ;;  %1254 = vmatpush3.msk.msra.mxu0 %vm1680_vm8, %v2532_v20  ;;  %1280 = vmatprep.subr.mxu1 %v460_v52  ;;  %vm1698_vm10 = vmand %vm96_vm12, %vm129_vm1  ;;  %v347_v60 = vsub.f32 %v1631_v43, %v2522_v53 }
  0x14   :  { %v2634_v59 = vsel %vm1698_vm10, 4294967295, %v2633_v59  ;;  %v466_v61 = vsub.f32 %v1576_v32, %v2521_v48  ;;  %v1708_v62 = vsub.f32 %v1128_v58, %v1128_v58  ;;  %v1143_v63 = vsel %vm1698_vm10, 1.0, %v2548_v24  ;;  %1255 = vmatprep.subr.msk.mxu0 %vm1698_vm10, %v2532_v20  ;;  %vm1716_vm1 = vmand %vm80_vm9, %vm113_vm6 }
  0x15   :  { %v2636_v0 = vsel %vm1716_vm1, 4294967295, %v2635_v0  ;;  %v60_v3 = vadd.s32 200, %v1490_v5  ;;  %v2520_v6 = vand.u32 4294901760, %v1594_v36  ;;  %v1722_v9 = vsub.f32 %v1143_v63, %v1143_v63  ;;  %1256 = vmatpush3.msk.msra.mxu0 %vm1716_vm1, %v2532_v20 }
  0x16   :  { %v348_v11 = vand.u32 4294901760, %v347_v60  ;;  %v1127_v12 = vsel %vm1716_vm1, 1.0, %v2548_v24  ;;  %v467_v13 = vand.u32 4294901760, %v466_v61  ;;  %v2637_v16 = vmov 0 }
  0x17   :  { %v1730_v14 = vsub.f32 %v1127_v12, %v1127_v12  ;;  %vm95_vm12 = vcmp.ge.s32.totalorder %v60_v3, %v1496_v10  ;;  %vm128_vm7 = vcmp.lt.s32.totalorder %v60_v3, %v1506_v17  ;;  %v354_v15 = vsub.f32 %v1594_v36, %v2520_v6 }
  0x18   :  { %1281 = vmatpush3.msra.mxu1 %v348_v11  ;;  %vm1737_vm9 = vmand %vm95_vm12, %vm128_vm7  ;;  %v44_v19 = vadd.s32 72, %v1490_v5  ;;  %v2513_v22 = vand.u32 4294901760, %v1612_v39  ;;  %v59_v23 = vadd.s32 192, %v1490_v5  ;;  %v2512_v25 = vand.u32 4294901760, %v1633_v44 }
  0x19   :  { %v2638_v16 = vsel %vm1737_vm9, 4294967295, %v2637_v16  ;;  %1282 = vmatprep.subr.mxu1 %v467_v13  ;;  %v1142_v26 = vsel %vm1737_vm9, 1.0, %v2548_v24  ;;  %1257 = vmatprep.subr.msk.mxu0 %vm1737_vm9, %v2532_v20  ;;  %v355_v29 = vand.u32 4294901760, %v354_v15  ;;  %v43_v30 = vadd.s32 64, %v1490_v5 }
  0x1a   :  { %v2511_v33 = vand.u32 4294901760, %v1651_v49  ;;  %v1753_v37 = vsub.f32 %v1142_v26, %v1142_v26  ;;  %vm79_vm6 = vcmp.ge.s32.totalorder %v44_v19, %v1496_v10  ;;  %vm112_vm12 = vcmp.lt.s32.totalorder %v44_v19, %v1506_v17 }
  0x1b   :  { %v473_v40 = vsub.f32 %v1612_v39, %v2513_v22  ;;  %1283 = vmatpush3.msra.mxu1 %v355_v29  ;;  %vm1760_vm7 = vmand %vm79_vm6, %vm112_vm12  ;;  %v2639_v42 = vmov 0  ;;  %vm94_vm9 = vcmp.ge.s32.totalorder %v59_v23, %v1496_v10  ;;  %vm127_vm1 = vcmp.lt.s32.totalorder %v59_v23, %v1506_v17 }
  0x1c   :  { %v2640_v42 = vsel %vm1760_vm7, 4294967295, %v2639_v42  ;;  %v361_v45 = vsub.f32 %v1633_v44, %v2512_v25  ;;  %vm78_vm10 = vcmp.ge.s32.totalorder %v43_v30, %v1496_v10  ;;  %v1126_v47 = vsel %vm1760_vm7, 1.0, %v2548_v24  ;;  %1258 = vmatpush3.msk.msra.mxu0 %vm1760_vm7, %v2532_v20  ;;  %vm1776_vm6 = vmand %vm94_vm9, %vm127_vm1 }
  0x1d   :  { %v474_v50 = vand.u32 4294901760, %v473_v40  ;;  %v2641_v52 = vmov 0  ;;  %vm111_vm12 = vcmp.lt.s32.totalorder %v43_v30, %v1506_v17  ;;  %v480_v55 = vsub.f32 %v1651_v49, %v2511_v33  ;;  %1259 = vmatprep.subr.msk.mxu0 %vm1776_vm6, %v2532_v20 }
  0x1e   :  { %v2642_v52 = vsel %vm1776_vm6, 4294967295, %v2641_v52  ;;  %v1784_v58 = vsub.f32 %v1126_v47, %v1126_v47  ;;  %v1141_v60 = vsel %vm1776_vm6, 1.0, %v2548_v24  ;;  %v362_v61 = vand.u32 4294901760, %v361_v45  ;;  %vm1792_vm1 = vmand %vm78_vm10, %vm111_vm12 }
  0x1f   :  { %v2643_v63 = vmov 0  ;;  %v58_v3 = vadd.s32 184, %v1490_v5  ;;  %1284 = vmatprep.subr.mxu1 %v474_v50  ;;  %v1797_v11 = vsub.f32 %v1141_v60, %v1141_v60  ;;  %v1125_v12 = vsel %vm1792_vm1, 1.0, %v2548_v24  ;;  %1260 = vmatpush3.msk.msra.mxu0 %vm1792_vm1, %v2532_v20 }
  0x20   :  { %v2644_v63 = vsel %vm1792_vm1, 4294967295, %v2643_v63  ;;  %v481_v13 = vand.u32 4294901760, %v480_v55  ;;  %v2510_v15 = vand.u32 4294901760, %v1668_v54  ;;  %1285 = vmatpush3.msra.mxu1 %v362_v61  ;;  %v1806_v19 = vsub.f32 %v1125_v12, %v1125_v12 }
  0x21   :  { %vm93_vm10 = vcmp.ge.s32.totalorder %v58_v3, %v1496_v10  ;;  %vm126_vm9 = vcmp.lt.s32.totalorder %v58_v3, %v1506_v17  ;;  %v42_v23 = vadd.s32 56, %v1490_v5  ;;  %v2645_v26 = vmov 0 }
  0x22   :  { %1286 = vmatprep.subr.mxu1 %v481_v13  ;;  %vm1811_vm12 = vmand %vm93_vm10, %vm126_vm9  ;;  %v368_v29 = vsub.f32 %v1668_v54, %v2510_v15  ;;  %v2506_v30 = vand.u32 4294901760, %v1686_v57  ;;  %v57_v40 = vadd.s32 176, %v1490_v5  ;;  %v2509_v45 = vand.u32 4294901760, %v1708_v62 }
  0x23   :  { %v2646_v26 = vsel %vm1811_vm12, 4294967295, %v2645_v26  ;;  %v1140_v47 = vsel %vm1811_vm12, 1.0, %v2548_v24  ;;  %1261 = vmatprep.subr.msk.mxu0 %vm1811_vm12, %v2532_v20  ;;  %vm77_vm10 = vcmp.ge.s32.totalorder %v42_v23, %v1496_v10  ;;  %vm110_vm9 = vcmp.lt.s32.totalorder %v42_v23, %v1506_v17 }
  0x24   :  { %v41_v50 = vadd.s32 48, %v1490_v5  ;;  %v1830_v55 = vsub.f32 %v1140_v47, %v1140_v47  ;;  %v369_v60 = vand.u32 4294901760, %v368_v29  ;;  %vm1832_vm1 = vmand %vm77_vm10, %vm110_vm9  ;;  %v2647_v61 = vmov 0 }
  0x25   :  { %v2648_v61 = vsel %vm1832_vm1, 4294967295, %v2647_v61  ;;  %v487_v3 = vsub.f32 %v1686_v57, %v2506_v30  ;;  %vm92_vm6 = vcmp.ge.s32.totalorder %v57_v40, %v1496_v10  ;;  %v1124_v12 = vsel %vm1832_vm1, 1.0, %v2548_v24  ;;  %1262 = vmatpush3.msk.msra.mxu0 %vm1832_vm1, %v2532_v20 }
  0x26   :  { %vm125_vm12 = vcmp.lt.s32.totalorder %v57_v40, %v1506_v17  ;;  %v375_v13 = vsub.f32 %v1708_v62, %v2509_v45  ;;  %vm76_vm10 = vcmp.ge.s32.totalorder %v41_v50, %v1496_v10  ;;  %1287 = vmatpush3.msra.mxu1 %v369_v60  ;;  %v1851_v23 = vsub.f32 %v1124_v12, %v1124_v12 }
  0x27   :  { %v488_v29 = vand.u32 4294901760, %v487_v3  ;;  %vm1853_vm9 = vmand %vm92_vm6, %vm125_vm12  ;;  %v2650_v47 = vmov 0  ;;  %vm109_vm7 = vcmp.lt.s32.totalorder %v41_v50, %v1506_v17  ;;  %v2519_v30 = vand.u32 4294901760, %v1722_v9 }
  0x28   :  { %2649 = vst [vmem:[#allocation3_spill] sm:$0xff] %v1851_v23  ;;  %v2651_v47 = vsel %vm1853_vm9, 4294967295, %v2650_v47  ;;  %v1139_v40 = vsel %vm1853_vm9, 1.0, %v2548_v24  ;;  %1263 = vmatprep.subr.msk.mxu0 %vm1853_vm9, %v2532_v20  ;;  %v376_v60 = vand.u32 4294901760, %v375_v13  ;;  %vm1865_vm1 = vmand %vm76_vm10, %vm109_vm7  ;;  %v2652_v12 = vmov 0 }
  0x29   :  { %v2653_v12 = vsel %vm1865_vm1, 4294967295, %v2652_v12  ;;  %v56_v3 = vadd.s32 168, %v1490_v5  ;;  %v2518_v45 = vand.u32 4294901760, %v1730_v14  ;;  %1288 = vmatprep.subr.mxu1 %v488_v29  ;;  %v1871_v50 = vsub.f32 %v1139_v40, %v1139_v40  ;;  %1264 = vmatpush3.msk.msra.mxu0 %vm1865_vm1, %v2532_v20 }
  0x2a   :  { %2654 = vst [vmem:[#allocation4_spill] sm:$0xff] %v2653_v12  ;;  %v1123_v15 = vsel %vm1865_vm1, 1.0, %v2548_v24  ;;  %v494_v13 = vsub.f32 %v1722_v9, %v2519_v30  ;;  %v40_v33 = vadd.s32 40, %v1490_v5  ;;  %1289 = vmatpush3.msra.mxu1 %v376_v60  ;;  %v2656_v22 = vmov 0 }
  0x2b   :  { %v1883_v25 = vsub.f32 %v1123_v15, %v1123_v15  ;;  %vm91_vm7 = vcmp.ge.s32.totalorder %v56_v3, %v1496_v10  ;;  %vm124_vm6 = vcmp.lt.s32.totalorder %v56_v3, %v1506_v17  ;;  %v382_v29 = vsub.f32 %v1730_v14, %v2518_v45 }
  0x2c   :  { %v495_v40 = vand.u32 4294901760, %v494_v13  ;;  %vm1890_vm12 = vmand %vm91_vm7, %vm124_vm6  ;;  %vm75_vm10 = vcmp.ge.s32.totalorder %v40_v33, %v1496_v10  ;;  %vm108_vm1 = vcmp.lt.s32.totalorder %v40_v33, %v1506_v17  ;;  %v2529_v15 = vand.u32 4294901760, %v1753_v37 }
  0x2d   :  { %2655 = vst [vmem:[#allocation5_spill] sm:$0xff] %v1883_v25  ;;  %v2657_v22 = vsel %vm1890_vm12, 4294967295, %v2656_v22  ;;  %v1138_v60 = vsel %vm1890_vm12, 1.0, %v2548_v24  ;;  %1265 = vmatprep.subr.msk.mxu0 %vm1890_vm12, %v2532_v20  ;;  %v383_v3 = vand.u32 4294901760, %v382_v29  ;;  %vm1903_vm9 = vmand %vm75_vm10, %vm108_vm1  ;;  %v2659_v13 = vmov 0 }
  0x2e   :  { %2658 = vst [vmem:[#allocation6_spill] sm:$0xff] %v2657_v22  ;;  %v2660_v13 = vsel %vm1903_vm9, 4294967295, %v2659_v13  ;;  %v55_v45 = vadd.s32 160, %v1490_v5  ;;  %v2528_v30 = vand.u32 4294901760, %v1784_v58  ;;  %1290 = vmatprep.subr.mxu1 %v495_v40  ;;  %v1909_v33 = vsub.f32 %v1138_v60, %v1138_v60  ;;  %1266 = vmatpush3.msk.msra.mxu0 %vm1903_vm9, %v2532_v20 }
  0x2f   :  { %2661 = vst [vmem:[#allocation7_spill] sm:$0xff] %v2660_v13  ;;  %v1122_v6 = vsel %vm1903_vm9, 1.0, %v2548_v24  ;;  %v501_v29 = vsub.f32 %v1753_v37, %v2529_v15  ;;  %v39_v48 = vadd.s32 32, %v1490_v5  ;;  %1291 = vmatpush3.msra.mxu1 %v383_v3  ;;  %v2662_v35 = vmov 0 }
  0x30   :  { %v1921_v53 = vsub.f32 %v1122_v6, %v1122_v6  ;;  %vm90_vm1 = vcmp.ge.s32.totalorder %v55_v45, %v1496_v10  ;;  %vm123_vm7 = vcmp.lt.s32.totalorder %v55_v45, %v1506_v17  ;;  %v389_v40 = vsub.f32 %v1784_v58, %v2528_v30 }
  0x31   :  { %v502_v60 = vand.u32 4294901760, %v501_v29  ;;  %vm1928_vm6 = vmand %vm90_vm1, %vm123_vm7  ;;  %vm74_vm10 = vcmp.ge.s32.totalorder %v39_v48, %v1496_v10  ;;  %vm107_vm9 = vcmp.lt.s32.totalorder %v39_v48, %v1506_v17  ;;  %v2539_v6 = vand.u32 4294901760, %v1797_v11 }
  0x32   :  { %v2663_v35 = vsel %vm1928_vm6, 4294967295, %v2662_v35  ;;  %v1137_v3 = vsel %vm1928_vm6, 1.0, %v2548_v24  ;;  %1267 = vmatprep.subr.msk.mxu0 %vm1928_vm6, %v2532_v20  ;;  %v390_v45 = vand.u32 4294901760, %v389_v40  ;;  %vm1941_vm12 = vmand %vm74_vm10, %vm107_vm9  ;;  %v2665_v29 = vmov 0 }
  0x33   :  { %2664 = vst [vmem:[#allocation8_spill] sm:$0xff] %v2663_v35  ;;  %v2666_v29 = vsel %vm1941_vm12, 4294967295, %v2665_v29  ;;  %v54_v30 = vadd.s32 152, %v1490_v5  ;;  %v2536_v15 = vand.u32 4294901760, %v1806_v19  ;;  %1292 = vmatprep.subr.mxu1 %v502_v60  ;;  %v1947_v48 = vsub.f32 %v1137_v3, %v1137_v3  ;;  %1268 = vmatpush3.msk.msra.mxu0 %vm1941_vm12, %v2532_v20 }
  0x34   :  { %2667 = vst [vmem:[#allocation9_spill] sm:$0xff] %v2666_v29  ;;  %v1121_v8 = vsel %vm1941_vm12, 1.0, %v2548_v24  ;;  %v508_v40 = vsub.f32 %v1797_v11, %v2539_v6  ;;  %v38_v7 = vadd.s32 24, %v1490_v5  ;;  %1293 = vmatpush3.msra.mxu1 %v390_v45  ;;  %v2668_v20 = vmov 0 }
  0x35   :  { %v1959_v35 = vsub.f32 %v1121_v8, %v1121_v8  ;;  %vm89_vm9 = vcmp.ge.s32.totalorder %v54_v30, %v1496_v10  ;;  %vm122_vm1 = vcmp.lt.s32.totalorder %v54_v30, %v1506_v17  ;;  %v396_v60 = vsub.f32 %v1806_v19, %v2536_v15 }
  0x36   :  { %v509_v3 = vand.u32 4294901760, %v508_v40  ;;  %vm1966_vm7 = vmand %vm89_vm9, %vm122_vm1  ;;  %vm73_vm10 = vcmp.ge.s32.totalorder %v38_v7, %v1496_v10  ;;  %vm106_vm12 = vcmp.lt.s32.totalorder %v38_v7, %v1506_v17  ;;  %v2671_v30 = vmov 1.0  }
  0x37   :  { %v2669_v20 = vsel %vm1966_vm7, 4294967295, %v2668_v20  ;;  %v1136_v45 = vsel %vm1966_vm7, 1.0, %v2548_v24  ;;  %1269 = vmatprep.subr.msk.mxu0 %vm1966_vm7, %v2671_v30  ;;  %v397_v15 = vand.u32 4294901760, %v396_v60  ;;  %vm1979_vm6 = vmand %vm73_vm10, %vm106_vm12  ;;  %v2672_v40 = vmov 0 }
  0x38   :  { %2670 = vst [vmem:[#allocation10_spill] sm:$0xff] %v2669_v20  ;;  %v2673_v40 = vsel %vm1979_vm6, 4294967295, %v2672_v40  ;;  %v53_v6 = vadd.s32 144, %v1490_v5  ;;  %v2554_v29 = vand.u32 4294901760, %v1851_v23  ;;  %1294 = vmatprep.subr.mxu1 %v509_v3  ;;  %v1985_v7 = vsub.f32 %v1136_v45, %v1136_v45  ;;  %1270 = vmatpush3.msk.msra.mxu0 %vm1979_vm6, %v2671_v30 }
  0x39   :  { %2674 = vst [vmem:[#allocation11_spill] sm:$0xff] %v2673_v40  ;;  %v1120_v8 = vsel %vm1979_vm6, 1.0, %v2548_v24  ;;  %v2676_v60 = vand.u32 4294901760, %v1830_v55  ;;  %v37_v13 = vadd.s32 16, %v1490_v5  ;;  %1295 = vmatpush3.msra.mxu1 %v397_v15  ;;  %v2678_v24 = vmov 0 }
  0x3a   :  { %2675 = vst [vmem:[#allocation12_spill] sm:$0xff] %v1985_v7  ;;  %v1997_v22 = vsub.f32 %v1120_v8, %v1120_v8  ;;  %vm88_vm12 = vcmp.ge.s32.totalorder %v53_v6, %v1496_v10  ;;  %vm121_vm9 = vcmp.lt.s32.totalorder %v53_v6, %v1506_v17  ;;  %v403_v3 = vsub.f32 %v1851_v23, %v2554_v29 }
  0x3b   :  { %v515_v20 = vsub.f32 %v1830_v55, %v2676_v60  ;;  %vm2004_vm1 = vmand %vm88_vm12, %vm121_vm9  ;;  %vm72_vm10 = vcmp.ge.s32.totalorder %v37_v13, %v1496_v10  ;;  %vm105_vm6 = vcmp.lt.s32.totalorder %v37_v13, %v1506_v17  ;;  %v2681_v8 = vmov 0.0  }
  0x3c   :  { %2677 = vst [vmem:[#allocation13_spill] sm:$0xff] %v1997_v22  ;;  %v2679_v24 = vsel %vm2004_vm1, 4294967295, %v2678_v24  ;;  %v1135_v60 = vsel %vm2004_vm1, 1.0, %v2681_v8  ;;  %1271 = vmatprep.subr.msk.mxu0 %vm2004_vm1, %v2671_v30  ;;  %v404_v6 = vand.u32 4294901760, %v403_v3  ;;  %vm2017_vm7 = vmand %vm72_vm10, %vm105_vm6  ;;  %v52_v29 = vadd.s32 136, %v1490_v5 }
  0x3d   :  { %v516_v45 = vand.u32 4294901760, %v515_v20  ;;  %2680 = vst [vmem:[#allocation14_spill] sm:$0xff] %v2679_v24  ;;  %v2682_v20 = vmov 0  ;;  %v2569_v40 = vand.u32 4294901760, %v1883_v25  ;;  %v2023_v13 = vsub.f32 %v1135_v60, %v1135_v60  ;;  %1272 = vmatpush3.msk.msra.mxu0 %vm2017_vm7, %v2671_v30 }
  0x3e   :  { %v2683_v20 = vsel %vm2017_vm7, 4294967295, %v2682_v20  ;;  %v1119_v15 = vsel %vm2017_vm7, 1.0, %v2681_v8  ;;  %v2686_v3 = vand.u32 4294901760, %v1871_v50  ;;  %v36_v12 = vadd.s32 8, %v1490_v5 }
  0x3f   :  { %2684 = vst [vmem:[#allocation15_spill] sm:$0xff] %v2683_v20  ;;  %1296 = vmatprep.subr.mxu1 %v516_v45  ;;  %2685 = vst [vmem:[#allocation16_spill] sm:$0xff] %v2023_v13  ;;  %v2035_v23 = vsub.f32 %v1119_v15, %v1119_v15  ;;  %vm87_vm6 = vcmp.ge.s32.totalorder %v52_v29, %v1496_v10  ;;  %vm120_vm12 = vcmp.lt.s32.totalorder %v52_v29, %v1506_v17  ;;  %v2687_v20 = vmov 0 }
  0x40   :  { %v522_v24 = vsub.f32 %v1871_v50, %v2686_v3  ;;  %1297 = vmatpush3.msra.mxu1 %v404_v6  ;;  %v410_v45 = vsub.f32 %v1883_v25, %v2569_v40  ;;  %vm2042_vm9 = vmand %vm87_vm6, %vm120_vm12  ;;  %vm71_vm10 = vcmp.ge.s32.totalorder %v36_v12, %v1496_v10  ;;  %vm104_vm7 = vcmp.lt.s32.totalorder %v36_v12, %v1506_v17 }
  0x41   :  { %v2688_v20 = vsel %vm2042_vm9, 4294967295, %v2687_v20  ;;  %v1134_v6 = vsel %vm2042_vm9, 1.0, %v2681_v8  ;;  %1273 = vmatprep.subr.msk.mxu0 %vm2042_vm9, %v2671_v30  ;;  %vm2055_vm1 = vmand %vm71_vm10, %vm104_vm7  ;;  %v51_v3 = vadd.s32 128, %v1490_v5  ;;  %vm70_vm7 = vcmp.ge.s32.totalorder %v1490_v5, %v1496_v10 }
  0x42   :  { %v523_v60 = vand.u32 4294901760, %v522_v24  ;;  %2689 = vst [vmem:[#allocation17_spill] sm:$0xff] %v2688_v20  ;;  %v411_v29 = vand.u32 4294901760, %v410_v45  ;;  %v2690_v24 = vmov 0  ;;  %v2061_v12 = vsub.f32 %v1134_v6, %v1134_v6  ;;  %1274 = vmatpush3.msk.msra.mxu0 %vm2055_vm1, %v2671_v30 }
  0x43   :  { %v2691_v24 = vsel %vm2055_vm1, 4294967295, %v2690_v24  ;;  %v1118_v15 = vsel %vm2055_vm1, 1.0, %v2681_v8  ;;  %v2694_v45 = vand.u32 4294901760, %v1909_v33  ;;  %vm86_vm6 = vcmp.ge.s32.totalorder %v51_v3, %v1496_v10 }
  0x44   :  { %2692 = vst [vmem:[#allocation18_spill] sm:$0xff] %v2691_v24  ;;  %1298 = vmatprep.subr.mxu1 %v523_v60  ;;  %2693 = vst [vmem:[#allocation19_spill] sm:$0xff] %v2061_v12  ;;  %v2074_v40 = vsub.f32 %v1118_v15, %v1118_v15  ;;  %vm119_vm12 = vcmp.lt.s32.totalorder %v51_v3, %v1506_v17  ;;  %v2696_v60 = vand.u32 4294901760, %v1921_v53  ;;  %v2697_v25 = vmov 0 }
  0x45   :  { %v529_v20 = vsub.f32 %v1909_v33, %v2694_v45  ;;  %1299 = vmatpush3.msra.mxu1 %v411_v29  ;;  %vm2081_vm10 = vmand %vm86_vm6, %vm119_vm12  ;;  %vm103_vm1 = vcmp.lt.s32.totalorder %v1490_v5, %v1506_v17  ;;  %v2583_v29 = vand.u32 4294901760, %v1947_v48  ;;  %v2700_v15 = vsub.f32 %v1481_v1, %v1486_v2 }
  0x46   :  { %2695 = vst [vmem:[#allocation20_spill] sm:$0xff] %v2074_v40  ;;  %v417_v6 = vsub.f32 %v1921_v53, %v2696_v60  ;;  %v2698_v25 = vsel %vm2081_vm10, 4294967295, %v2697_v25  ;;  %v1133_v3 = vsel %vm2081_vm10, 1.0, %v2681_v8  ;;  %1275 = vmatprep.subr.msk.mxu0 %vm2081_vm10, %v2671_v30  ;;  %vm2097_vm6 = vmand %vm70_vm7, %vm103_vm1  ;;  %v2701_v45 = vmov 0 }
  0x47   :  { %v530_v24 = vand.u32 4294901760, %v529_v20  ;;  %2699 = vst [vmem:[#allocation21_spill] sm:$0xff] %v2698_v25  ;;  %v14_v10 = vadd.f32 1e-06, %v2700_v15  ;;  %v2702_v45 = vsel %vm2097_vm6, 4294967295, %v2701_v45  ;;  %v2704_v17 = vunpack.c.0.s8 %v1488_v4  ;;  %1276 = vmatpush3.msk.msra.mxu0 %vm2097_vm6, %v2671_v30 }
  0x48   :  { %v418_v20 = vand.u32 4294901760, %v417_v6  ;;  %2703 = vst [vmem:[#allocation22_spill] sm:$0xff] %v2702_v45  ;;  %v2582_v1 = vand.u32 4294901760, %v1959_v35  ;;  %v2105_v2 = vsub.f32 %v1133_v3, %v1133_v3  ;;  %v1117_v15 = vsel %vm2097_vm6, 1.0, %v2681_v8  ;;  %1315 = vmatprep.subr.mxu0 %v1554_v28 }
  0x49   :  { %v22_v60 = vsub.s32 %v2704_v17, %v1490_v5  ;;  %1300 = vmatprep.subr.mxu1 %v530_v24  ;;  %v536_v6 = vsub.f32 %v1947_v48, %v2583_v29  ;;  %v15_v25 = vmul.f32 %v14_v10, %v14_v10  ;;  %v2116_v4 = vsub.f32 %v1117_v15, %v1117_v15 }
  0x4a   :  { %2705 = vst [vmem:[#allocation23_spill] sm:$0xff] %v2105_v2  ;;  %1301 = vmatpush3.msra.mxu1 %v418_v20  ;;  %v424_v5 = vsub.f32 %v1959_v35, %v2582_v1  ;;  %v2585_v8 = vand.u32 4294901760, %v1985_v7  ;;  %v2584_v24 = vand.u32 4294901760, %v1997_v22  ;;  %v2591_v45 = vand.u32 4294901760, %v2023_v13 }
  0x4b   :  { %v537_v3 = vand.u32 4294901760, %v536_v6  ;;  %v2124_v17 = vrot.slane %v15_v25, %v22_v60  ;;  %v2594_v10 = vand.u32 4294901760, %v2035_v23  ;;  %v2595_v29 = vand.u32 4294901760, %v2061_v12 }
  0x4c   :  { %v425_v20 = vand.u32 4294901760, %v424_v5  ;;  %v543_v15 = vsub.f32 %v1985_v7, %v2585_v8  ;;  %v431_v1 = vsub.f32 %v1997_v22, %v2584_v24  ;;  %v550_v6 = vsub.f32 %v2023_v13, %v2591_v45 }
  0x4d   :  { %2706 = vst [vmem:[#allocation24_spill] sm:$0xff] %v2124_v17  ;;  %1302 = vmatprep.subr.mxu1 %v537_v3  ;;  %v2137_v25 = vcombine.high %v2124_v17, %v2124_v17  ;;  %v2140_v60 = vand.u32 4294901760, %v2124_v17  ;;  %v438_v5 = vsub.f32 %v2035_v23, %v2594_v10  ;;  %v557_v3 = vsub.f32 %v2061_v12, %v2595_v29 }
  0x4e   :  { %1303 = vmatpush3.msra.mxu1 %v425_v20  ;;  %v544_v24 = vand.u32 4294901760, %v543_v15  ;;  %v432_v8 = vand.u32 4294901760, %v431_v1  ;;  %v2598_v28 = vand.u32 4294901760, %v2074_v40  ;;  %v551_v45 = vand.u32 4294901760, %v550_v6 }
  0x4f   :  { %2707 = vst [vmem:[#allocation25_spill] sm:$0xff] %v2137_v25  ;;  %2708 = vst [vmem:[#allocation26_spill] sm:$0xff] %v2140_v60  ;;  %v2153_v22 = vand.u32 4294901760, %v2137_v25  ;;  %v2157_v7 = vsub.f32 %v2124_v17, %v2140_v60  ;;  %v439_v13 = vand.u32 4294901760, %v438_v5  ;;  %v558_v10 = vand.u32 4294901760, %v557_v3 }
  0x50   :  { %1304 = vmatprep.subr.mxu1 %v544_v24  ;;  %v445_v1 = vsub.f32 %v2074_v40, %v2598_v28  ;;  %v2600_v20 = vand.u32 4294901760, %v2105_v2  ;;  %v2602_v15 = vand.u32 4294901760, %v2116_v4  ;;  %vm2709_vm1 = vnez %v2634_v59 }
  0x51   :  { %v2166_v29 = vsub.f32 %v2137_v25, %v2153_v22  ;;  %v2603_v12 = vand.u32 4294901760, %v2157_v7  ;;  %1305 = vmatpush3.msra.mxu1 %v432_v8  ;;  %568 = vmatprep.mubr.f32.mxu1 %v2153_v22  ;;  %vm2710_vm7 = vnez %v2636_v0  ;;  %vm2711_vm12 = vnez %v2638_v16 }
  0x52   :  { %1306 = vmatprep.subr.mxu1 %v551_v45  ;;  %v446_v24 = vand.u32 4294901760, %v445_v1  ;;  %v564_v6 = vsub.f32 %v2105_v2, %v2600_v20  ;;  %v452_v5 = vsub.f32 %v2116_v4, %v2602_v15  ;;  %v2736_v15 = vld [vmem:[#allocation14_spill] sm:$0xff]  ;;  %v2756_v18 = vand.u32 4294901760, %v1651_v49 }
  0x53   :  { %v2604_v3 = vand.u32 4294901760, %v2166_v29  ;;  %v336_v28 = vsub.f32 %v2157_v7, %v2603_v12  ;;  %1307 = vmatpush3.msra.mxu1 %v439_v13  ;;  %v2719_v13 = vld [vmem:[#allocation4_spill] sm:$0xff]  ;;  %v2747_v17 = vand.u32 4294901760, %v2166_v29  ;;  %v2757_v21 = vand.u32 4294901760, %v1668_v54 }
  0x54   :  { %1308 = vmatprep.subr.mxu1 %v558_v10  ;;  %v565_v8 = vand.u32 4294901760, %v564_v6  ;;  %v453_v25 = vand.u32 4294901760, %v452_v5  ;;  %v2721_v10 = vld [vmem:[#allocation6_spill] sm:$0xff]  ;;  %v2728_v6 = vld [vmem:[#allocation9_spill] sm:$0xff]  ;;  %v2738_v12 = vld [vmem:[#allocation16_spill] sm:$0xff]  ;;  %v2758_v27 = vand.u32 4294901760, %v1686_v57 }
  0x55   :  { %v330_v45 = vsub.f32 %v2166_v29, %v2604_v3  ;;  %1309 = vmatpush3.msra.mxu1 %v446_v24  ;;  %v337_v1 = vand.u32 4294901760, %v336_v28  ;;  %v2718_v28 = vld [vmem:[#allocation3_spill] sm:$0xff]  ;;  %v2726_v24 = vld [vmem:[#allocation8_spill] sm:$0xff]  ;;  %v2730_v5 = vld [vmem:[#allocation10_spill] sm:$0xff]  ;;  %v2759_v31 = vand.u32 4294901760, %v1708_v62  ;;  %v2760_v34 = vand.u32 4294901760, %v1722_v9 }
  0x56   :  { %1310 = vmatprep.subr.mxu1 %v565_v8  ;;  %v2732_v8 = vld [vmem:[#allocation12_spill] sm:$0xff]  ;;  %v2739_v3 = vld [vmem:[#allocation15_spill] sm:$0xff]  ;;  %v2763_v38 = vand.u32 4294901760, %v1753_v37  ;;  %v2767_v41 = vand.u32 4294901760, %v1797_v11  ;;  %v2771_v46 = vand.u32 4294901760, %v1830_v55  ;;  %v2775_v51 = vand.u32 4294901760, %v1871_v50 }
  0x57   :  { %v331_v20 = vand.u32 4294901760, %v330_v45  ;;  %1311 = vmatpush3.msra.mxu1 %v453_v25  ;;  %v2723_v25 = vld [vmem:[#allocation5_spill] sm:$0xff]  ;;  %v2733_v45 = vld [vmem:[#allocation11_spill] sm:$0xff] }
  0x58   :  { %570 = vmatmul.mubr.f32.vlgmr.msra.gmra.mxu1 %v2140_v60  ;;  %1350 = vmatprep.subr.msk.mxu1 %vm1518_vm11, %v2671_v30  ;;  %v2742_v60 = vld [vmem:[#allocation19_spill] sm:$0xff] }
  0x59   :  { %332 = vmatprep.mubr.f32.mxu0 %v331_v20  ;;  %1351 = vmatpush3.msk.msra.mxu1 %vm1531_vm15, %v2671_v30  ;;  %v2724_v20 = vld [vmem:[#allocation7_spill] sm:$0xff] }
  0x5a   :  { %338 = vmatmul.mubr.f32.vlgmr.msra.gmra.mxu0 %v337_v1  ;;  %1352 = vmatprep.subr.msk.mxu1 %vm1548_vm0, %v2671_v30  ;;  %v2735_v1 = vld [vmem:[#allocation13_spill] sm:$0xff] }
  0x5b   :  { %1316 = vmatpush3.msra.mxu0 %v1631_v43  ;;  %1353 = vmatpush3.msk.msra.mxu1 %vm1569_vm2, %v2671_v30 }
  0x5c   :  { %1317 = vmatprep.subr.mxu0 %v1576_v32  ;;  %1354 = vmatprep.subr.msk.mxu1 %vm1588_vm3, %v2671_v30 }
  0x5d   :  { %1318 = vmatpush3.msra.mxu0 %v1594_v36  ;;  %1355 = vmatpush3.msk.msra.mxu1 %vm1606_vm4, %v2671_v30 }
  0x5e   :  { %1319 = vmatprep.subr.mxu0 %v1612_v39  ;;  %1356 = vmatprep.subr.msk.mxu1 %vm1624_vm5, %v2671_v30 }
  0x5f   :  { %1320 = vmatpush3.msra.mxu0 %v1633_v44  ;;  %1357 = vmatpush3.msk.msra.mxu1 %vm1645_vm13, %v2671_v30 }
  0x60   :  { %1321 = vmatprep.subr.mxu0 %v1651_v49  ;;  %1358 = vmatprep.subr.msk.mxu1 %vm1663_vm14, %v2671_v30  ;;  %v2773_v49 = vand.u32 4294901760, %v2718_v28 }
  0x61   :  { %1322 = vmatpush3.msra.mxu0 %v1668_v54  ;;  %1359 = vmatpush3.msk.msra.mxu1 %vm1680_vm8, %v2671_v30  ;;  %vm2712_vm8 = vnez %v2640_v42  ;;  %v2777_v54 = vand.u32 4294901760, %v2723_v25 }
  0x62   :  { %1323 = vmatprep.subr.mxu0 %v1686_v57  ;;  %1360 = vmatprep.subr.msk.mxu1 %vm2709_vm1, %v2671_v30  ;;  %vm2713_vm1 = vnez %v2642_v52  ;;  %v2781_v57 = vand.u32 4294901760, %v1921_v53 }
  0x63   :  { %1324 = vmatpush3.msra.mxu0 %v1708_v62  ;;  %1361 = vmatpush3.msk.msra.mxu1 %vm2710_vm7, %v2671_v30  ;;  %vm2714_vm7 = vnez %v2644_v63  ;;  %v2785_v62 = vand.u32 4294901760, %v1959_v35 }
  0x64   :  { %1325 = vmatprep.subr.mxu0 %v1722_v9  ;;  %1362 = vmatprep.subr.msk.mxu1 %vm2711_vm12, %v2671_v30  ;;  %vm2715_vm12 = vnez %v2646_v26  ;;  %v2790_v9 = vand.u32 4294901760, %v2738_v12 }
  0x65   :  { %1326 = vmatpush3.msra.mxu0 %v1730_v14  ;;  %1363 = vmatpush3.msk.msra.mxu1 %vm2712_vm8, %v2671_v30  ;;  %vm2716_vm8 = vnez %v2648_v61 }
  0x66   :  { %1327 = vmatprep.subr.mxu0 %v1753_v37  ;;  %1364 = vmatprep.subr.msk.mxu1 %vm2713_vm1, %v2671_v30  ;;  %vm2717_vm1 = vnez %v2651_v47  ;;  %v2795_v37 = vld [vmem:[#allocation11_spill] sm:$0xff] }
  0x67   :  { %1328 = vmatpush3.msra.mxu0 %v1784_v58  ;;  %1365 = vmatpush3.msk.msra.mxu1 %vm2714_vm7, %v2671_v30  ;;  %vm2720_vm7 = vnez %v2719_v13 }
  0x68   :  { %1329 = vmatprep.subr.mxu0 %v1797_v11  ;;  %1366 = vmatprep.subr.msk.mxu1 %vm2715_vm12, %v2671_v30  ;;  %vm2722_vm12 = vnez %v2721_v10 }
  0x69   :  { %1330 = vmatpush3.msra.mxu0 %v1806_v19  ;;  %1367 = vmatpush3.msk.msra.mxu1 %vm2716_vm8, %v2671_v30  ;;  %vm2725_vm8 = vnez %v2724_v20 }
  0x6a   :  { %1331 = vmatprep.subr.mxu0 %v1830_v55  ;;  %1368 = vmatprep.subr.msk.mxu1 %vm2717_vm1, %v2671_v30  ;;  %vm2734_vm1 = vnez %v2733_v45  ;;  %v2743_v45 = vld [vmem:[#allocation18_spill] sm:$0xff] }
  0x6b   :  { %1332 = vmatpush3.msra.mxu0 %v2718_v28  ;;  %1369 = vmatpush3.msk.msra.mxu1 %vm2720_vm7, %v2671_v30  ;;  %vm2727_vm7 = vnez %v2726_v24 }
  0x6c   :  { %1333 = vmatprep.subr.mxu0 %v1871_v50  ;;  %1370 = vmatprep.subr.msk.mxu1 %vm2722_vm12, %v2671_v30  ;;  %vm2729_vm12 = vnez %v2728_v6  ;;  %v2808_v50 = vld [vmem:[#allocation24_spill] sm:$0xff] }
  0x6d   :  { %1334 = vmatpush3.msra.mxu0 %v2723_v25  ;;  %1371 = vmatpush3.msk.msra.mxu1 %vm2725_vm8, %v2671_v30  ;;  %vm2731_vm8 = vnez %v2730_v5 }
  0x6e   :  { %1335 = vmatprep.subr.mxu0 %v1909_v33  ;;  %705 = vmatprep.mubr.f32.mxu0 %v2166_v29  ;;  %v2753_v29 = vand.u32 4294901760, %v1594_v36  ;;  %v2761_v36 = vand.u32 4294901760, %v1730_v14  ;;  %v2793_v14 = vld [vmem:[#allocation19_spill] sm:$0xff] }
  0x6f   :  { %1336 = vmatpush3.msra.mxu0 %v1921_v53  ;;  %1372 = vmatprep.subr.msk.mxu1 %vm2727_vm7, %v2671_v30  ;;  %vm2737_vm7 = vnez %v2736_v15  ;;  %v2751_v15 = vand.u32 4294901760, %v2157_v7  ;;  %v2787_v53 = vand.u32 4294901760, %v2732_v8 }
  0x70   :  { %1337 = vmatprep.subr.mxu0 %v1947_v48  ;;  %1373 = vmatpush3.msk.msra.mxu1 %vm2729_vm12, %v2671_v30  ;;  %vm2740_vm12 = vnez %v2739_v3 }
  0x71   :  { %1338 = vmatpush3.msra.mxu0 %v1959_v35  ;;  %1374 = vmatprep.subr.msk.mxu1 %vm2731_vm8, %v2671_v30  ;;  %v2792_v35 = vand.u32 4294901760, %v2035_v23 }
  0x72   :  { %1339 = vmatprep.subr.mxu0 %v2732_v8  ;;  %1375 = vmatpush3.msk.msra.mxu1 %vm2734_vm1, %v2671_v30  ;;  %vm2744_vm1 = vnez %v2743_v45  ;;  %v2748_v45 = vld [vmem:[#allocation2_spill] sm:$0xff] }
  0x73   :  { %1340 = vmatpush3.msra.mxu0 %v2735_v1  ;;  %1376 = vmatprep.subr.msk.mxu1 %vm2737_vm7, %v2671_v30 }
  0x74   :  { %1341 = vmatprep.subr.mxu0 %v2738_v12  ;;  %1377 = vmatpush3.msk.msra.mxu1 %vm2740_vm12, %v2671_v30 }
  0x75   :  { %1342 = vmatpush3.msra.mxu0 %v2035_v23  ;;  %1378 = vmatprep.subr.msk.mxu1 %vm2042_vm9, %v2671_v30 }
  0x76   :  { %1343 = vmatprep.subr.mxu0 %v2742_v60  ;;  %1379 = vmatpush3.msk.msra.mxu1 %vm2744_vm1, %v2671_v30  ;;  %v2749_v60 = vand.u32 4294901760, %v2748_v45 }
  0x77   :  { %1344 = vmatpush3.msra.mxu0 %v2074_v40  ;;  %1380 = vmatprep.subr.msk.mxu1 %vm2081_vm10, %v2671_v30  ;;  %v2750_v40 = vand.u32 4294901760, %v1631_v43  ;;  %v2754_v43 = vand.u32 4294901760, %v1612_v39  ;;  %v2765_v39 = vand.u32 4294901760, %v1784_v58 }
  0x78   :  { %1345 = vmatprep.subr.mxu0 %v2105_v2  ;;  %1381 = vmatpush3.msk.msra.mxu1 %vm2097_vm6, %v2671_v30  ;;  %v2752_v2 = vand.u32 4294901760, %v1576_v32  ;;  %v2755_v32 = vand.u32 4294901760, %v1633_v44  ;;  %v2769_v44 = vand.u32 4294901760, %v1806_v19 }
  0x79   :  { %1346 = vmatpush3.msra.mxu0 %v2116_v4  ;;  %812 = vmatprep.mubr.f32.mxu1 %v2747_v17 }
  0x7a   :  { %708 = vmatmul.mubr.f32.vlgmr.msra.gmra.mxu0 %v2157_v7  ;;  %1385 = vmatprep.subr.mxu0 %v2749_v60 }
  0x7b   :  { %1386 = vmatpush3.msra.mxu0 %v2750_v40  ;;  %816 = vmatmul.mubr.f32.vlgmr.msra.gmra.mxu1 %v2751_v15 }
  0x7c   :  { %1387 = vmatprep.subr.mxu0 %v2752_v2  ;;  %1420 = vmatprep.subr.msk.mxu1 %vm1518_vm11, %v2671_v30  ;;  %vm2762_vm11 = vnez %v2632_v56  ;;  %v2779_v56 = vand.u32 4294901760, %v1909_v33 }
  0x7d   :  { %1388 = vmatpush3.msra.mxu0 %v2753_v29  ;;  %1421 = vmatpush3.msk.msra.mxu1 %vm1531_vm15, %v2671_v30  ;;  %vm2764_vm15 = vnez %v2634_v59  ;;  %v2783_v59 = vand.u32 4294901760, %v1947_v48  ;;  %v2809_v48 = vld [vmem:[#allocation25_spill] sm:$0xff] }
  0x7e   :  { %1389 = vmatprep.subr.mxu0 %v2754_v43  ;;  %1422 = vmatprep.subr.msk.mxu1 %vm1548_vm0, %v2671_v30  ;;  %vm2766_vm0 = vnez %v2636_v0  ;;  %v2788_v0 = vand.u32 4294901760, %v2735_v1 }
  0x7f   :  { %1390 = vmatpush3.msra.mxu0 %v2755_v32  ;;  %1423 = vmatpush3.msk.msra.mxu1 %vm1569_vm2, %v2671_v30  ;;  %vm2768_vm2 = vnez %v2638_v16  ;;  %v2794_v16 = vand.u32 4294901760, %v2793_v14 }
  0x80   :  { %1391 = vmatprep.subr.mxu0 %v2756_v18  ;;  %1424 = vmatprep.subr.msk.mxu1 %vm1588_vm3, %v2671_v30  ;;  %vm2770_vm3 = vnez %v2640_v42  ;;  %v2797_v42 = vld [vmem:[#allocation20_spill] sm:$0xff] }
  0x81   :  { %1392 = vmatpush3.msra.mxu0 %v2757_v21  ;;  %1425 = vmatpush3.msk.msra.mxu1 %vm1606_vm4, %v2671_v30  ;;  %vm2772_vm4 = vnez %v2642_v52  ;;  %v2798_v52 = vand.u32 4294901760, %v2797_v42 }
  0x82   :  { %1393 = vmatprep.subr.mxu0 %v2758_v27  ;;  %1426 = vmatprep.subr.msk.mxu1 %vm1624_vm5, %v2671_v30  ;;  %vm2774_vm5 = vnez %v2644_v63  ;;  %v2800_v63 = vld [vmem:[#allocation23_spill] sm:$0xff] }
  0x83   :  { %1394 = vmatpush3.msra.mxu0 %v2759_v31  ;;  %1427 = vmatpush3.msk.msra.mxu1 %vm1645_vm13, %v2671_v30  ;;  %vm2776_vm13 = vnez %v2646_v26  ;;  %v2801_v11 = vand.u32 4294901760, %v2800_v63  ;;  %v2803_v26 = vand.u32 4294901760, %v2116_v4 }
  0x84   :  { %1395 = vmatprep.subr.mxu0 %v2760_v34  ;;  %1428 = vmatprep.subr.msk.mxu1 %vm1663_vm14, %v2671_v30  ;;  %vm2778_vm14 = vnez %v2648_v61  ;;  %v2805_v61 = vld [vmem:[#allocation26_spill] sm:$0xff] }
  0x85   :  { %1396 = vmatpush3.msra.mxu0 %v2761_v36  ;;  %1429 = vmatpush3.msk.msra.mxu1 %vm2762_vm11, %v2671_v30  ;;  %vm2780_vm11 = vnez %v2651_v47 }
  0x86   :  { %1397 = vmatprep.subr.mxu0 %v2763_v38  ;;  %1430 = vmatprep.subr.msk.mxu1 %vm2764_vm15, %v2671_v30  ;;  %vm2782_vm15 = vnez %v2719_v13 }
  0x87   :  { %1398 = vmatpush3.msra.mxu0 %v2765_v39  ;;  %1431 = vmatpush3.msk.msra.mxu1 %vm2766_vm0, %v2671_v30  ;;  %vm2784_vm0 = vnez %v2721_v10 }
  0x88   :  { %1399 = vmatprep.subr.mxu0 %v2767_v41  ;;  %1432 = vmatprep.subr.msk.mxu1 %vm2768_vm2, %v2671_v30  ;;  %vm2786_vm2 = vnez %v2724_v20 }
  0x89   :  { %1400 = vmatpush3.msra.mxu0 %v2769_v44  ;;  %1433 = vmatpush3.msk.msra.mxu1 %vm2770_vm3, %v2671_v30  ;;  %vm2789_vm3 = vnez %v2726_v24 }
  0x8a   :  { %1401 = vmatprep.subr.mxu0 %v2771_v46  ;;  %1434 = vmatprep.subr.msk.mxu1 %vm2772_vm4, %v2671_v30  ;;  %vm2791_vm4 = vnez %v2728_v6 }
  0x8b   :  { %1402 = vmatpush3.msra.mxu0 %v2773_v49  ;;  %1435 = vmatpush3.msk.msra.mxu1 %vm2774_vm5, %v2671_v30  ;;  %vm2796_vm5 = vnez %v2795_v37 }
  0x8c   :  { %1403 = vmatprep.subr.mxu0 %v2775_v51  ;;  %1436 = vmatprep.subr.msk.mxu1 %vm2776_vm13, %v2671_v30 }
  0x8d   :  { %1404 = vmatpush3.msra.mxu0 %v2777_v54  ;;  %1437 = vmatpush3.msk.msra.mxu1 %vm2778_vm14, %v2671_v30 }
  0x8e   :  { %1405 = vmatprep.subr.mxu0 %v2779_v56  ;;  %1438 = vmatprep.subr.msk.mxu1 %vm2780_vm11, %v2671_v30 }
  0x8f   :  { %1406 = vmatpush3.msra.mxu0 %v2781_v57  ;;  %1439 = vmatpush3.msk.msra.mxu1 %vm2782_vm15, %v2671_v30 }
  0x90   :  { %1407 = vmatprep.subr.mxu0 %v2783_v59  ;;  %1440 = vmatprep.subr.msk.mxu1 %vm2784_vm0, %v2671_v30 }
  0x91   :  { %1408 = vmatpush3.msra.mxu0 %v2785_v62  ;;  %1441 = vmatpush3.msk.msra.mxu1 %vm2786_vm2, %v2671_v30 }
  0x92   :  { %1409 = vmatprep.subr.mxu0 %v2787_v53  ;;  %982 = vmatprep.mubr.f32.mxu0 %v2153_v22 }
  0x93   :  { %1410 = vmatpush3.msra.mxu0 %v2788_v0  ;;  %1442 = vmatprep.subr.msk.mxu1 %vm2789_vm3, %v2671_v30 }
  0x94   :  { %1411 = vmatprep.subr.mxu0 %v2790_v9  ;;  %1443 = vmatpush3.msk.msra.mxu1 %vm2791_vm4, %v2671_v30 }
  0x95   :  { %1412 = vmatpush3.msra.mxu0 %v2792_v35  ;;  %1444 = vmatprep.subr.msk.mxu1 %vm2731_vm8, %v2671_v30  ;;  %vm27_vm8 = vcmask 1041408  }
  0x96   :  { %1413 = vmatprep.subr.mxu0 %v2794_v16  ;;  %1445 = vmatpush3.msk.msra.mxu1 %vm2796_vm5, %v2671_v30  ;;  %v28_v33 = vsel %vm27_vm8, %v2808_v50, 0.0  ;;  %v29_v40 = vsel %vm27_vm8, %v2809_v48, 0.0 }
  0x97   :  { %1414 = vmatpush3.msra.mxu0 %v2798_v52  ;;  %1446 = vmatprep.subr.msk.mxu1 %vm2737_vm7, %v2671_v30  ;;  %v30_v7 = vadd.f32 %v29_v40, %v28_v33  ;;  %vm1111_vm7 = vcmask 9224  }
  0x98   :  { %1415 = vmatprep.subr.mxu0 %v2801_v11  ;;  %1447 = vmatpush3.msk.msra.mxu1 %vm2740_vm12, %v2671_v30 }
  0x99   :  { %1416 = vmatpush3.msra.mxu0 %v2803_v26  ;;  %1448 = vmatprep.subr.msk.mxu1 %vm2042_vm9, %v2671_v30  ;;  %vm1109_vm9 = vcmask 1024  }
  0x9a   :  { %984 = vmatmul.mubr.f32.vlgmr.msra.gmra.mxu0 %v2805_v61  ;;  %1449 = vmatpush3.msk.msra.mxu1 %vm2744_vm1, %v2671_v30  ;;  %vm1103_vm1 = vcmask 58368  }
  0x9b   :  { %1450 = vmatprep.subr.msk.mxu1 %vm2081_vm10, %v2671_v30  ;;  %1086 = vmatprep.mubr.f32.mxu1 %v2153_v22 }
  0x9c   :  { %1451 = vmatpush3.msk.msra.mxu1 %vm2097_vm6, %v2671_v30  ;;  %31 = vadd.xlane.f32.xlu0 %v30_v7 }
  0x9d   :  { %1088 = vmatmul.mubr.f32.vlgmr.msra.gmra.mxu1 %v2805_v61 }
 0x118   :  { %v1312_v2 = vpop.f32.mrf.mxu1 }
 0x11a   :  { %v1277_v12 = vpop.f32.mrf.mxu0  ;;  %v1313_v17 = vpop.f32.mrf.mxu1 }
 0x11b   :  { %v1314_v28 = vadd.f32 %v1313_v17, %v1312_v2 }
 0x11c   :  { %v1278_v4 = vpop.f32.mrf.mxu0 }
 0x11d   :  { %v1279_v3 = vadd.f32 %v1278_v4, %v1277_v12 }
 0x11f   :  { %v572_v10 = vadd.f32 %v1314_v28, %v1279_v3 }
 0x125   :  { %v32_v21 = vpop.xlane.xlu0 %31 }
 0x126   :  { %v33_v31 = vmul.f32 0.125, %v32_v21 }
 0x128   :  { %1110 = vst.msk [vmem:[%s2491_s2] sm:$0x3] %vm1109_vm9, %v33_v31 }
 0x13a   :  { %v1347_v60 = vpop.f32.mrf.mxu0 }
 0x13b   :  { %v1382_v15 = vpop.f32.mrf.mxu1 }
 0x13c   :  { %v1348_v22 = vpop.f32.mrf.mxu0 }
 0x13d   :  { %v1383_v13 = vpop.f32.mrf.mxu1  ;;  %v1349_v30 = vadd.f32 %v1348_v22, %v1347_v60 }
 0x13e   :  { %v1384_v25 = vadd.f32 %v1383_v13, %v1382_v15 }
 0x13f   :  { %v710_v24 = vadd.f32 %v1349_v30, %v572_v10 }
 0x141   :  { %v818_v45 = vadd.f32 %v1384_v25, %v710_v24 }
 0x15a   :  { %v1417_v20 = vpop.f32.mrf.mxu0 }
 0x15c   :  { %v1418_v6 = vpop.f32.mrf.mxu0 }
 0x15d   :  { %v1419_v5 = vadd.f32 %v1418_v6, %v1417_v20  ;;  %v1452_v8 = vpop.f32.mrf.mxu1 }
 0x15f   :  { %v1453_v1 = vpop.f32.mrf.mxu1  ;;  %v986_v29 = vadd.f32 %v1419_v5, %v818_v45 }
 0x160   :  { %v1454_v43 = vadd.f32 %v1453_v1, %v1452_v8 }
 0x162   :  { %v1090_v32 = vadd.f32 %v1454_v43, %v986_v29 }
 0x164   :  { %1458 = vrsqrt.f32 %v1090_v32  ;;  %vm1095_vm10 = vcmp.eq.f32.partialorder %v1090_v32, inf  ;;  %v1098_v34 = vand.u32 2147483648, %v1090_v32  ;;  %vm1097_vm6 = vcmp.eq.f32.partialorder %v1090_v32, 0.0 }
 0x171   :  { %v1459_v18 = vpop.eup %1458 }
 0x172   :  { %v1094_v27 = vmul.f32 %v1459_v18, %v1090_v32 }
 0x174   :  { %v1096_v36 = vsel %vm1095_vm10, %v1090_v32, %v1094_v27 }
 0x175   :  { %v1099_v38 = vsel %vm1097_vm6, %v1098_v34, %v1096_v36 }
 0x176   :  { %v1100_v39 = vsub.f32 2.0, %v1099_v38 }
 0x178   :  { %v1101_v41 = vmax.f32 %v1100_v39, 0.0 }
 0x17a   :  { %v1102_v44 = vmul.f32 %v1101_v41, %v1101_v41 }
 0x17c   :  { %v1104_v46 = vsel %vm1103_vm1, %v1102_v44, 0.0 }
 0x17d   :  { %1105 = vadd.xlane.f32.xlu0 %v1104_v46 }
 0x206   :  { %v1106_v49 = vpop.xlane.xlu0 %1105 }
 0x207   :  { %v1108_v51 = vmul.f32 0.125, %v1106_v49 }
 0x209   :  { %1112 = vst.msk [vmem:[%s2491_s2] sm:$0x3] %vm1111_vm7, %v1108_v51 }

</bundles_post_ra>
